<compile_context>
chip_gen: v6e
topology: v6e:2x2x1
jax: 0.10.0
libtpu: 0.0.40
codegen_flags: <defaults>
</compile_context>

<pallas_src>
import functools

import jax
import jax.numpy as jnp
from jax import lax
from jax.experimental import pallas as pl
from jax.experimental.pallas import tpu as pltpu

_LANE = 128


def _lstm_kernel(x_ref, wih_ref, whh_ref, b_ref, wl_ref, bl_ref,
                 out_ref, hist_scr, *, hidden_size, seq_len):
    H = hidden_size

    # (1) Hoisted input projection: one (S, I) @ (I, 4H) matmul + bias for all
    #     timesteps, kept as a value (registers) rather than VMEM scratch.
    gx = (jnp.dot(x_ref[...], wih_ref[...],
                  preferred_element_type=jnp.float32) + b_ref[...])

    # Load the recurrent weight once before the loop so it stays resident.
    # TODO(synk): if bundle dumps show Mosaic re-streaming this RHS every step,
    # switch to explicit pltpu.matmul_push_rhs / matmul_acc_lhs / matmul_pop.
    whh = whh_ref[...]                          # (H, 4H)

    h = jnp.zeros((1, H), jnp.float32)          # PyTorch default h0 = 0
    c = jnp.zeros((1, H), jnp.float32)          # PyTorch default c0 = 0

    # seq_len is a small static int -> full static unroll keeps the whole
    # serial chain visible to the scheduler and h/c/gx in vector registers.
    # TODO(synk): for long seq_len, switch to a seq-chunk grid axis marked
    # "arbitrary" with h/c carried in persistent VMEM scratch instead.
    for t in range(seq_len):
        # Recurrent contribution only: (1, H) @ (H, 4H).
        gates = gx[t:t + 1, :] + jnp.dot(h, whh,
                                         preferred_element_type=jnp.float32)

        # Two full-row transcendental (EUP) passes; extraction is static
        # lane slicing (layout only).  Lane groups: i | f | g | o.
        sig = jax.nn.sigmoid(gates)
        th = jnp.tanh(gates)
        i_g = sig[:, 0 * H:1 * H]
        f_g = sig[:, 1 * H:2 * H]
        g_g = th[:, 2 * H:3 * H]
        o_g = sig[:, 3 * H:4 * H]

        c = f_g * c + i_g * g_g
        h = o_g * jnp.tanh(c)
        hist_scr[pl.ds(t, 1), :] = h            # deferred-head history

    # (2) Deferred, lane-dense linear head: single (S, H) @ (H, 128) matmul
    #     (head weight zero-padded to a full 128-lane output) + one unmasked
    #     full-width store.  Real O columns are sliced out in the wrapper.
    y = (jnp.dot(hist_scr[...], wl_ref[...],
                 preferred_element_type=jnp.float32) + bl_ref[...])
    out_ref[...] = y.astype(out_ref.dtype)


def lstm_rnn_forward(x, params):
    """x: (seq_len, input_size) float32. Returns (seq_len, output_size)."""
    S, I = x.shape
    w_ih, w_hh = params["w_ih"], params["w_hh"]
    b_ih, b_hh = params["b_ih"], params["b_hh"]
    w_lin, b_lin = params["w_lin"], params["b_lin"]
    H = w_hh.shape[1]
    O = w_lin.shape[0]
    G = 4 * H

    # Pre-transpose so the kernel does plain row-major matmuls; fold biases.
    wih_t = w_ih.T.astype(jnp.float32)                           # (I, 4H)
    whh_t = w_hh.T.astype(jnp.float32)                           # (H, 4H)
    bias = (b_ih + b_hh).reshape(1, G).astype(jnp.float32)       # (1, 4H)

    # Lane-dense head: pad the O outputs up to a multiple of 128 lanes so the
    # head matmul has a dense N and the output store is an unmasked vst.
    O_pad = max(_LANE, ((O + _LANE - 1) // _LANE) * _LANE)
    wl_pad = jnp.zeros((H, O_pad), jnp.float32).at[:, :O].set(
        w_lin.T.astype(jnp.float32))                             # (H, 128)
    bl_pad = jnp.zeros((1, O_pad), jnp.float32).at[:, :O].set(
        b_lin.astype(jnp.float32))                               # (1, 128)

    kernel = functools.partial(_lstm_kernel, hidden_size=H, seq_len=S)
    vmem = pl.BlockSpec(memory_space=pltpu.MemorySpace.VMEM)

    out_pad = pl.pallas_call(
        kernel,
        out_shape=jax.ShapeDtypeStruct((S, O_pad), jnp.float32),
        in_specs=[vmem] * 6,
        out_specs=vmem,
        scratch_shapes=[
            pltpu.VMEM((S, H), jnp.float32),   # h history (deferred head)
        ],
    )(x.astype(jnp.float32), wih_t, whh_t, bias, wl_pad, bl_pad)
    # TODO(synk): if a batch / independent-sequence axis is added, expose it as
    # a leading grid axis marked "parallel" (uses v7x's second TensorCore) and
    # size any seq-chunk streaming against v7x's 64 MiB VMEM.
    return out_pad[:, :O]


def init_params(key, input_size, hidden_size, output_size):
    """Deterministic synthetic init (shapes match nn.LSTM / nn.Linear)."""
    ks = jax.random.split(key, 6)
    scale = 1.0 / jnp.sqrt(hidden_size)
    return {
        "w_ih": jax.random.uniform(ks[0], (4 * hidden_size, input_size),
                                   minval=-scale, maxval=scale, dtype=jnp.float32),
        "w_hh": jax.random.uniform(ks[1], (4 * hidden_size, hidden_size),
                                   minval=-scale, maxval=scale, dtype=jnp.float32),
        "b_ih": jax.random.uniform(ks[2], (4 * hidden_size,),
                                   minval=-scale, maxval=scale, dtype=jnp.float32),
        "b_hh": jax.random.uniform(ks[3], (4 * hidden_size,),
                                   minval=-scale, maxval=scale, dtype=jnp.float32),
        "w_lin": jax.random.uniform(ks[4], (output_size, hidden_size),
                                    minval=-scale, maxval=scale, dtype=jnp.float32),
        "b_lin": jax.random.uniform(ks[5], (output_size,),
                                    minval=-scale, maxval=scale, dtype=jnp.float32),
    }


def lstm_rnn_reference(x, params):
    """Pure-JAX reference of the PyTorch forward (for correctness check)."""
    H = params["w_hh"].shape[1]
    w_ih_t, w_hh_t = params["w_ih"].T, params["w_hh"].T
    bias = params["b_ih"] + params["b_hh"]
    hi = lax.Precision.HIGHEST

    def step(carry, x_t):
        h, c = carry
        gates = (jnp.dot(x_t, w_ih_t, precision=hi)
                 + jnp.dot(h, w_hh_t, precision=hi) + bias)
        i = jax.nn.sigmoid(gates[0 * H:1 * H])
        f = jax.nn.sigmoid(gates[1 * H:2 * H])
        g = jnp.tanh(gates[2 * H:3 * H])
        o = jax.nn.sigmoid(gates[3 * H:4 * H])
        c = f * c + i * g
        h = o * jnp.tanh(c)
        return (h, c), h

    h0 = jnp.zeros((H,), jnp.float32)
    c0 = jnp.zeros((H,), jnp.float32)
    _, hs = lax.scan(step, (h0, c0), x)
    return jnp.dot(hs, params["w_lin"].T, precision=hi) + params["b_lin"]


if __name__ == "__main__":
    seq_len, input_size, hidden_size, output_size = 8, 4, 32, 1

    key = jax.random.PRNGKey(0)
    k_x, k_p = jax.random.split(key)
    x = jax.random.normal(k_x, (seq_len, input_size), dtype=jnp.float32)
    params = init_params(k_p, input_size, hidden_size, output_size)

    y = lstm_rnn_forward(x, params)
    y = jax.block_until_ready(y)

    y_ref = lstm_rnn_reference(x, params)
    assert y.shape == (seq_len, output_size)
    assert jnp.allclose(y, y_ref, atol=1e-4, rtol=1e-4)

    print("KERNEL_OK")
</pallas_src>

<mosaic_0001>
module attributes {stable_mosaic.version = 11 : i64} {
  func.func @_lstm_kernel(%arg0: memref<8x4xf32, #tpu.memory_space<vmem>>, %arg1: memref<4x128xf32, #tpu.memory_space<vmem>>, %arg2: memref<32x128xf32, #tpu.memory_space<vmem>>, %arg3: memref<1x128xf32, #tpu.memory_space<vmem>>, %arg4: memref<32x128xf32, #tpu.memory_space<vmem>>, %arg5: memref<1x128xf32, #tpu.memory_space<vmem>>, %arg6: memref<8x128xf32, #tpu.memory_space<vmem>>, %arg7: memref<8x32xf32, #tpu.memory_space<vmem>>) attributes {dimension_semantics = [], scalar_prefetch = 0 : i64, scratch_operands = 1 : i64, tpu.core_type = #tpu.core_type<tc>} {
    %c0 = arith.constant 0 : index
    %c0_0 = arith.constant 0 : index
    %0 = vector.load %arg0[%c0, %c0_0] : memref<8x4xf32, #tpu.memory_space<vmem>>, vector<8x4xf32>
    %c0_1 = arith.constant 0 : index
    %c0_2 = arith.constant 0 : index
    %1 = vector.load %arg1[%c0_1, %c0_2] : memref<4x128xf32, #tpu.memory_space<vmem>>, vector<4x128xf32>
    %cst = arith.constant dense<0.000000e+00> : vector<8x128xf32>
    %2 = tpu.matmul %0, %1, %cst {dimension_numbers = #tpu.dot_dimension_numbers<[1], [0], [0], [1], [0, 0, 1, 1], [], []>} : vector<8x4xf32>, vector<4x128xf32>, vector<8x128xf32> -> vector<8x128xf32>
    %c0_3 = arith.constant 0 : index
    %c0_4 = arith.constant 0 : index
    %3 = vector.load %arg3[%c0_3, %c0_4] : memref<1x128xf32, #tpu.memory_space<vmem>>, vector<1x128xf32>
    %4 = vector.broadcast %3 : vector<1x128xf32> to vector<8x128xf32>
    %5 = arith.addf %2, %4 : vector<8x128xf32>
    %c0_5 = arith.constant 0 : index
    %c0_6 = arith.constant 0 : index
    %6 = vector.load %arg2[%c0_5, %c0_6] : memref<32x128xf32, #tpu.memory_space<vmem>>, vector<32x128xf32>
    %cst_7 = arith.constant 0.000000e+00 : f32
    %7 = vector.broadcast %cst_7 : f32 to vector<1x32xf32>
    %cst_8 = arith.constant 0.000000e+00 : f32
    %8 = vector.broadcast %cst_8 : f32 to vector<1x32xf32>
    %9 = vector.extract_strided_slice %5 {offsets = [0, 0], sizes = [1, 128], strides = [1, 1]} : vector<8x128xf32> to vector<1x128xf32>
    %cst_9 = arith.constant dense<0.000000e+00> : vector<1x128xf32>
    %10 = tpu.matmul %7, %6, %cst_9 {dimension_numbers = #tpu.dot_dimension_numbers<[1], [0], [0], [1], [0, 0, 1, 1], [], []>} : vector<1x32xf32>, vector<32x128xf32>, vector<1x128xf32> -> vector<1x128xf32>
    %11 = arith.addf %9, %10 : vector<1x128xf32>
    %12 = arith.negf %11 : vector<1x128xf32>
    %13 = math.exp %12 : vector<1x128xf32>
    %cst_10 = arith.constant 1.000000e+00 : f32
    %14 = vector.broadcast %cst_10 : f32 to vector<1x128xf32>
    %15 = arith.addf %14, %13 : vector<1x128xf32>
    %16 = arith.divf %14, %15 : vector<1x128xf32>
    %17 = math.tanh %11 : vector<1x128xf32>
    %18 = vector.extract_strided_slice %16 {offsets = [0, 0], sizes = [1, 32], strides = [1, 1]} : vector<1x128xf32> to vector<1x32xf32>
    %19 = vector.extract_strided_slice %16 {offsets = [0, 32], sizes = [1, 32], strides = [1, 1]} : vector<1x128xf32> to vector<1x32xf32>
    %20 = vector.extract_strided_slice %17 {offsets = [0, 64], sizes = [1, 32], strides = [1, 1]} : vector<1x128xf32> to vector<1x32xf32>
    %21 = vector.extract_strided_slice %16 {offsets = [0, 96], sizes = [1, 32], strides = [1, 1]} : vector<1x128xf32> to vector<1x32xf32>
    %22 = arith.mulf %19, %8 : vector<1x32xf32>
    %23 = arith.mulf %18, %20 : vector<1x32xf32>
    %24 = arith.addf %22, %23 : vector<1x32xf32>
    %25 = math.tanh %24 : vector<1x32xf32>
    %26 = arith.mulf %21, %25 : vector<1x32xf32>
    %c0_11 = arith.constant 0 : index
    %c0_12 = arith.constant 0 : index
    %27 = vector.load %arg7[%c0_11, %c0_12] : memref<8x32xf32, #tpu.memory_space<vmem>>, vector<1x32xf32>
    tpu.vector_store %arg7[%c0_11, %c0_12], %26 {strides = array<i32>} : memref<8x32xf32, #tpu.memory_space<vmem>>, vector<1x32xf32>,
    %28 = vector.extract_strided_slice %5 {offsets = [1, 0], sizes = [1, 128], strides = [1, 1]} : vector<8x128xf32> to vector<1x128xf32>
    %cst_13 = arith.constant dense<0.000000e+00> : vector<1x128xf32>
    %29 = tpu.matmul %26, %6, %cst_13 {dimension_numbers = #tpu.dot_dimension_numbers<[1], [0], [0], [1], [0, 0, 1, 1], [], []>} : vector<1x32xf32>, vector<32x128xf32>, vector<1x128xf32> -> vector<1x128xf32>
    %30 = arith.addf %28, %29 : vector<1x128xf32>
    %31 = arith.negf %30 : vector<1x128xf32>
    %32 = math.exp %31 : vector<1x128xf32>
    %cst_14 = arith.constant 1.000000e+00 : f32
    %33 = vector.broadcast %cst_14 : f32 to vector<1x128xf32>
    %34 = arith.addf %33, %32 : vector<1x128xf32>
    %35 = arith.divf %33, %34 : vector<1x128xf32>
    %36 = math.tanh %30 : vector<1x128xf32>
    %37 = vector.extract_strided_slice %35 {offsets = [0, 0], sizes = [1, 32], strides = [1, 1]} : vector<1x128xf32> to vector<1x32xf32>
    %38 = vector.extract_strided_slice %35 {offsets = [0, 32], sizes = [1, 32], strides = [1, 1]} : vector<1x128xf32> to vector<1x32xf32>
    %39 = vector.extract_strided_slice %36 {offsets = [0, 64], sizes = [1, 32], strides = [1, 1]} : vector<1x128xf32> to vector<1x32xf32>
    %40 = vector.extract_strided_slice %35 {offsets = [0, 96], sizes = [1, 32], strides = [1, 1]} : vector<1x128xf32> to vector<1x32xf32>
    %41 = arith.mulf %38, %24 : vector<1x32xf32>
    %42 = arith.mulf %37, %39 : vector<1x32xf32>
    %43 = arith.addf %41, %42 : vector<1x32xf32>
    %44 = math.tanh %43 : vector<1x32xf32>
    %45 = arith.mulf %40, %44 : vector<1x32xf32>
    %c1 = arith.constant 1 : index
    %c0_15 = arith.constant 0 : index
    %46 = vector.load %arg7[%c1, %c0_15] : memref<8x32xf32, #tpu.memory_space<vmem>>, vector<1x32xf32>
    tpu.vector_store %arg7[%c1, %c0_15], %45 {strides = array<i32>} : memref<8x32xf32, #tpu.memory_space<vmem>>, vector<1x32xf32>,
    %47 = vector.extract_strided_slice %5 {offsets = [2, 0], sizes = [1, 128], strides = [1, 1]} : vector<8x128xf32> to vector<1x128xf32>
    %cst_16 = arith.constant dense<0.000000e+00> : vector<1x128xf32>
    %48 = tpu.matmul %45, %6, %cst_16 {dimension_numbers = #tpu.dot_dimension_numbers<[1], [0], [0], [1], [0, 0, 1, 1], [], []>} : vector<1x32xf32>, vector<32x128xf32>, vector<1x128xf32> -> vector<1x128xf32>
    %49 = arith.addf %47, %48 : vector<1x128xf32>
    %50 = arith.negf %49 : vector<1x128xf32>
    %51 = math.exp %50 : vector<1x128xf32>
    %cst_17 = arith.constant 1.000000e+00 : f32
    %52 = vector.broadcast %cst_17 : f32 to vector<1x128xf32>
    %53 = arith.addf %52, %51 : vector<1x128xf32>
    %54 = arith.divf %52, %53 : vector<1x128xf32>
    %55 = math.tanh %49 : vector<1x128xf32>
    %56 = vector.extract_strided_slice %54 {offsets = [0, 0], sizes = [1, 32], strides = [1, 1]} : vector<1x128xf32> to vector<1x32xf32>
    %57 = vector.extract_strided_slice %54 {offsets = [0, 32], sizes = [1, 32], strides = [1, 1]} : vector<1x128xf32> to vector<1x32xf32>
    %58 = vector.extract_strided_slice %55 {offsets = [0, 64], sizes = [1, 32], strides = [1, 1]} : vector<1x128xf32> to vector<1x32xf32>
    %59 = vector.extract_strided_slice %54 {offsets = [0, 96], sizes = [1, 32], strides = [1, 1]} : vector<1x128xf32> to vector<1x32xf32>
    %60 = arith.mulf %57, %43 : vector<1x32xf32>
    %61 = arith.mulf %56, %58 : vector<1x32xf32>
    %62 = arith.addf %60, %61 : vector<1x32xf32>
    %63 = math.tanh %62 : vector<1x32xf32>
    %64 = arith.mulf %59, %63 : vector<1x32xf32>
    %c2 = arith.constant 2 : index
    %c0_18 = arith.constant 0 : index
    %65 = vector.load %arg7[%c2, %c0_18] : memref<8x32xf32, #tpu.memory_space<vmem>>, vector<1x32xf32>
    tpu.vector_store %arg7[%c2, %c0_18], %64 {strides = array<i32>} : memref<8x32xf32, #tpu.memory_space<vmem>>, vector<1x32xf32>,
    %66 = vector.extract_strided_slice %5 {offsets = [3, 0], sizes = [1, 128], strides = [1, 1]} : vector<8x128xf32> to vector<1x128xf32>
    %cst_19 = arith.constant dense<0.000000e+00> : vector<1x128xf32>
    %67 = tpu.matmul %64, %6, %cst_19 {dimension_numbers = #tpu.dot_dimension_numbers<[1], [0], [0], [1], [0, 0, 1, 1], [], []>} : vector<1x32xf32>, vector<32x128xf32>, vector<1x128xf32> -> vector<1x128xf32>
    %68 = arith.addf %66, %67 : vector<1x128xf32>
    %69 = arith.negf %68 : vector<1x128xf32>
    %70 = math.exp %69 : vector<1x128xf32>
    %cst_20 = arith.constant 1.000000e+00 : f32
    %71 = vector.broadcast %cst_20 : f32 to vector<1x128xf32>
    %72 = arith.addf %71, %70 : vector<1x128xf32>
    %73 = arith.divf %71, %72 : vector<1x128xf32>
    %74 = math.tanh %68 : vector<1x128xf32>
    %75 = vector.extract_strided_slice %73 {offsets = [0, 0], sizes = [1, 32], strides = [1, 1]} : vector<1x128xf32> to vector<1x32xf32>
    %76 = vector.extract_strided_slice %73 {offsets = [0, 32], sizes = [1, 32], strides = [1, 1]} : vector<1x128xf32> to vector<1x32xf32>
    %77 = vector.extract_strided_slice %74 {offsets = [0, 64], sizes = [1, 32], strides = [1, 1]} : vector<1x128xf32> to vector<1x32xf32>
    %78 = vector.extract_strided_slice %73 {offsets = [0, 96], sizes = [1, 32], strides = [1, 1]} : vector<1x128xf32> to vector<1x32xf32>
    %79 = arith.mulf %76, %62 : vector<1x32xf32>
    %80 = arith.mulf %75, %77 : vector<1x32xf32>
    %81 = arith.addf %79, %80 : vector<1x32xf32>
    %82 = math.tanh %81 : vector<1x32xf32>
    %83 = arith.mulf %78, %82 : vector<1x32xf32>
    %c3 = arith.constant 3 : index
    %c0_21 = arith.constant 0 : index
    %84 = vector.load %arg7[%c3, %c0_21] : memref<8x32xf32, #tpu.memory_space<vmem>>, vector<1x32xf32>
    tpu.vector_store %arg7[%c3, %c0_21], %83 {strides = array<i32>} : memref<8x32xf32, #tpu.memory_space<vmem>>, vector<1x32xf32>,
    %85 = vector.extract_strided_slice %5 {offsets = [4, 0], sizes = [1, 128], strides = [1, 1]} : vector<8x128xf32> to vector<1x128xf32>
    %cst_22 = arith.constant dense<0.000000e+00> : vector<1x128xf32>
    %86 = tpu.matmul %83, %6, %cst_22 {dimension_numbers = #tpu.dot_dimension_numbers<[1], [0], [0], [1], [0, 0, 1, 1], [], []>} : vector<1x32xf32>, vector<32x128xf32>, vector<1x128xf32> -> vector<1x128xf32>
    %87 = arith.addf %85, %86 : vector<1x128xf32>
    %88 = arith.negf %87 : vector<1x128xf32>
    %89 = math.exp %88 : vector<1x128xf32>
    %cst_23 = arith.constant 1.000000e+00 : f32
    %90 = vector.broadcast %cst_23 : f32 to vector<1x128xf32>
    %91 = arith.addf %90, %89 : vector<1x128xf32>
    %92 = arith.divf %90, %91 : vector<1x128xf32>
    %93 = math.tanh %87 : vector<1x128xf32>
    %94 = vector.extract_strided_slice %92 {offsets = [0, 0], sizes = [1, 32], strides = [1, 1]} : vector<1x128xf32> to vector<1x32xf32>
    %95 = vector.extract_strided_slice %92 {offsets = [0, 32], sizes = [1, 32], strides = [1, 1]} : vector<1x128xf32> to vector<1x32xf32>
    %96 = vector.extract_strided_slice %93 {offsets = [0, 64], sizes = [1, 32], strides = [1, 1]} : vector<1x128xf32> to vector<1x32xf32>
    %97 = vector.extract_strided_slice %92 {offsets = [0, 96], sizes = [1, 32], strides = [1, 1]} : vector<1x128xf32> to vector<1x32xf32>
    %98 = arith.mulf %95, %81 : vector<1x32xf32>
    %99 = arith.mulf %94, %96 : vector<1x32xf32>
    %100 = arith.addf %98, %99 : vector<1x32xf32>
    %101 = math.tanh %100 : vector<1x32xf32>
    %102 = arith.mulf %97, %101 : vector<1x32xf32>
    %c4 = arith.constant 4 : index
    %c0_24 = arith.constant 0 : index
    %103 = vector.load %arg7[%c4, %c0_24] : memref<8x32xf32, #tpu.memory_space<vmem>>, vector<1x32xf32>
    tpu.vector_store %arg7[%c4, %c0_24], %102 {strides = array<i32>} : memref<8x32xf32, #tpu.memory_space<vmem>>, vector<1x32xf32>,
    %104 = vector.extract_strided_slice %5 {offsets = [5, 0], sizes = [1, 128], strides = [1, 1]} : vector<8x128xf32> to vector<1x128xf32>
    %cst_25 = arith.constant dense<0.000000e+00> : vector<1x128xf32>
    %105 = tpu.matmul %102, %6, %cst_25 {dimension_numbers = #tpu.dot_dimension_numbers<[1], [0], [0], [1], [0, 0, 1, 1], [], []>} : vector<1x32xf32>, vector<32x128xf32>, vector<1x128xf32> -> vector<1x128xf32>
    %106 = arith.addf %104, %105 : vector<1x128xf32>
    %107 = arith.negf %106 : vector<1x128xf32>
    %108 = math.exp %107 : vector<1x128xf32>
    %cst_26 = arith.constant 1.000000e+00 : f32
    %109 = vector.broadcast %cst_26 : f32 to vector<1x128xf32>
    %110 = arith.addf %109, %108 : vector<1x128xf32>
    %111 = arith.divf %109, %110 : vector<1x128xf32>
    %112 = math.tanh %106 : vector<1x128xf32>
    %113 = vector.extract_strided_slice %111 {offsets = [0, 0], sizes = [1, 32], strides = [1, 1]} : vector<1x128xf32> to vector<1x32xf32>
    %114 = vector.extract_strided_slice %111 {offsets = [0, 32], sizes = [1, 32], strides = [1, 1]} : vector<1x128xf32> to vector<1x32xf32>
    %115 = vector.extract_strided_slice %112 {offsets = [0, 64], sizes = [1, 32], strides = [1, 1]} : vector<1x128xf32> to vector<1x32xf32>
    %116 = vector.extract_strided_slice %111 {offsets = [0, 96], sizes = [1, 32], strides = [1, 1]} : vector<1x128xf32> to vector<1x32xf32>
    %117 = arith.mulf %114, %100 : vector<1x32xf32>
    %118 = arith.mulf %113, %115 : vector<1x32xf32>
    %119 = arith.addf %117, %118 : vector<1x32xf32>
    %120 = math.tanh %119 : vector<1x32xf32>
    %121 = arith.mulf %116, %120 : vector<1x32xf32>
    %c5 = arith.constant 5 : index
    %c0_27 = arith.constant 0 : index
    %122 = vector.load %arg7[%c5, %c0_27] : memref<8x32xf32, #tpu.memory_space<vmem>>, vector<1x32xf32>
    tpu.vector_store %arg7[%c5, %c0_27], %121 {strides = array<i32>} : memref<8x32xf32, #tpu.memory_space<vmem>>, vector<1x32xf32>,
    %123 = vector.extract_strided_slice %5 {offsets = [6, 0], sizes = [1, 128], strides = [1, 1]} : vector<8x128xf32> to vector<1x128xf32>
    %cst_28 = arith.constant dense<0.000000e+00> : vector<1x128xf32>
    %124 = tpu.matmul %121, %6, %cst_28 {dimension_numbers = #tpu.dot_dimension_numbers<[1], [0], [0], [1], [0, 0, 1, 1], [], []>} : vector<1x32xf32>, vector<32x128xf32>, vector<1x128xf32> -> vector<1x128xf32>
    %125 = arith.addf %123, %124 : vector<1x128xf32>
    %126 = arith.negf %125 : vector<1x128xf32>
    %127 = math.exp %126 : vector<1x128xf32>
    %cst_29 = arith.constant 1.000000e+00 : f32
    %128 = vector.broadcast %cst_29 : f32 to vector<1x128xf32>
    %129 = arith.addf %128, %127 : vector<1x128xf32>
    %130 = arith.divf %128, %129 : vector<1x128xf32>
    %131 = math.tanh %125 : vector<1x128xf32>
    %132 = vector.extract_strided_slice %130 {offsets = [0, 0], sizes = [1, 32], strides = [1, 1]} : vector<1x128xf32> to vector<1x32xf32>
    %133 = vector.extract_strided_slice %130 {offsets = [0, 32], sizes = [1, 32], strides = [1, 1]} : vector<1x128xf32> to vector<1x32xf32>
    %134 = vector.extract_strided_slice %131 {offsets = [0, 64], sizes = [1, 32], strides = [1, 1]} : vector<1x128xf32> to vector<1x32xf32>
    %135 = vector.extract_strided_slice %130 {offsets = [0, 96], sizes = [1, 32], strides = [1, 1]} : vector<1x128xf32> to vector<1x32xf32>
    %136 = arith.mulf %133, %119 : vector<1x32xf32>
    %137 = arith.mulf %132, %134 : vector<1x32xf32>
    %138 = arith.addf %136, %137 : vector<1x32xf32>
    %139 = math.tanh %138 : vector<1x32xf32>
    %140 = arith.mulf %135, %139 : vector<1x32xf32>
    %c6 = arith.constant 6 : index
    %c0_30 = arith.constant 0 : index
    %141 = vector.load %arg7[%c6, %c0_30] : memref<8x32xf32, #tpu.memory_space<vmem>>, vector<1x32xf32>
    tpu.vector_store %arg7[%c6, %c0_30], %140 {strides = array<i32>} : memref<8x32xf32, #tpu.memory_space<vmem>>, vector<1x32xf32>,
    %142 = vector.extract_strided_slice %5 {offsets = [7, 0], sizes = [1, 128], strides = [1, 1]} : vector<8x128xf32> to vector<1x128xf32>
    %cst_31 = arith.constant dense<0.000000e+00> : vector<1x128xf32>
    %143 = tpu.matmul %140, %6, %cst_31 {dimension_numbers = #tpu.dot_dimension_numbers<[1], [0], [0], [1], [0, 0, 1, 1], [], []>} : vector<1x32xf32>, vector<32x128xf32>, vector<1x128xf32> -> vector<1x128xf32>
    %144 = arith.addf %142, %143 : vector<1x128xf32>
    %145 = arith.negf %144 : vector<1x128xf32>
    %146 = math.exp %145 : vector<1x128xf32>
    %cst_32 = arith.constant 1.000000e+00 : f32
    %147 = vector.broadcast %cst_32 : f32 to vector<1x128xf32>
    %148 = arith.addf %147, %146 : vector<1x128xf32>
    %149 = arith.divf %147, %148 : vector<1x128xf32>
    %150 = math.tanh %144 : vector<1x128xf32>
    %151 = vector.extract_strided_slice %149 {offsets = [0, 0], sizes = [1, 32], strides = [1, 1]} : vector<1x128xf32> to vector<1x32xf32>
    %152 = vector.extract_strided_slice %149 {offsets = [0, 32], sizes = [1, 32], strides = [1, 1]} : vector<1x128xf32> to vector<1x32xf32>
    %153 = vector.extract_strided_slice %150 {offsets = [0, 64], sizes = [1, 32], strides = [1, 1]} : vector<1x128xf32> to vector<1x32xf32>
    %154 = vector.extract_strided_slice %149 {offsets = [0, 96], sizes = [1, 32], strides = [1, 1]} : vector<1x128xf32> to vector<1x32xf32>
    %155 = arith.mulf %152, %138 : vector<1x32xf32>
    %156 = arith.mulf %151, %153 : vector<1x32xf32>
    %157 = arith.addf %155, %156 : vector<1x32xf32>
    %158 = math.tanh %157 : vector<1x32xf32>
    %159 = arith.mulf %154, %158 : vector<1x32xf32>
    %c7 = arith.constant 7 : index
    %c0_33 = arith.constant 0 : index
    %160 = vector.load %arg7[%c7, %c0_33] : memref<8x32xf32, #tpu.memory_space<vmem>>, vector<1x32xf32>
    tpu.vector_store %arg7[%c7, %c0_33], %159 {strides = array<i32>} : memref<8x32xf32, #tpu.memory_space<vmem>>, vector<1x32xf32>,
    %c0_34 = arith.constant 0 : index
    %c0_35 = arith.constant 0 : index
    %161 = vector.load %arg7[%c0_34, %c0_35] : memref<8x32xf32, #tpu.memory_space<vmem>>, vector<8x32xf32>
    %c0_36 = arith.constant 0 : index
    %c0_37 = arith.constant 0 : index
    %162 = vector.load %arg4[%c0_36, %c0_37] : memref<32x128xf32, #tpu.memory_space<vmem>>, vector<32x128xf32>
    %cst_38 = arith.constant dense<0.000000e+00> : vector<8x128xf32>
    %163 = tpu.matmul %161, %162, %cst_38 {dimension_numbers = #tpu.dot_dimension_numbers<[1], [0], [0], [1], [0, 0, 1, 1], [], []>} : vector<8x32xf32>, vector<32x128xf32>, vector<8x128xf32> -> vector<8x128xf32>
    %c0_39 = arith.constant 0 : index
    %c0_40 = arith.constant 0 : index
    %164 = vector.load %arg5[%c0_39, %c0_40] : memref<1x128xf32, #tpu.memory_space<vmem>>, vector<1x128xf32>
    %165 = vector.broadcast %164 : vector<1x128xf32> to vector<8x128xf32>
    %166 = arith.addf %163, %165 : vector<8x128xf32>
    %c0_41 = arith.constant 0 : index
    %c0_42 = arith.constant 0 : index
    %167 = vector.load %arg6[%c0_41, %c0_42] : memref<8x128xf32, #tpu.memory_space<vmem>>, vector<8x128xf32>
    tpu.vector_store %arg6[%c0_41, %c0_42], %166 {strides = array<i32>} : memref<8x128xf32, #tpu.memory_space<vmem>>, vector<8x128xf32>,
    return
  }
}

</mosaic_0001>

<bundles_post_ra>
// kernel: tpu_custom_call.1
= control target key start
LH: loop header
LB: loop body
LE: loop exit
PB: predicated region body
PF: predicated region fallthrough
CT: control target
= control target key end

     0   :  { %11 = vsyncpa [#allocation4], 0  ;;  %s1676_s0 = inlined_call_operand.vmem [shape: f32[8,4], index: 0, kind: input, shape index: {}]   ;;  %s1677_s1 = inlined_call_operand.vmem [shape: f32[4,128], index: 1, kind: input, shape index: {}]   ;;  %s1678_s2 = inlined_call_operand.hbm [shape: f32[32,128], index: 2, kind: input, shape index: {}]   ;;  %s1679_s3 = inlined_call_operand.vmem [shape: f32[1,128], index: 3, kind: input, shape index: {}]   ;;  %s1680_s4 = inlined_call_operand.hbm [shape: f32[32,128], index: 4, kind: input, shape index: {}]   ;;  %s1681_s5 = inlined_call_operand.vmem [shape: f32[1,128], index: 5, kind: input, shape index: {}]   ;;  %s1682_s6 = inlined_call_operand.hbm [shape: f32[8,128], index: 6, kind: output, shape index: {}]  }
   0x1   :  { %12 = vsyncpa [#allocation7], 0 }
   0x2   :  { %13 = vsyncpa [#allocation5], 0  ;;  %s1441_s21 = smov [#allocation3]  }
   0x3   :  { %s23_s22 = sshll.u32 %s1441_s21, 4  ;;  %s24_s22 = int_to_ptr.vmem [resolvable:$true] %s23_s22 }
   0x4   :  { %s1383_s23 = scalar_lea.vmem %s24_s22, 512  ;;  %p1388_p1 = scmp.lt.s32.totalorder %s24_s22, %s24_s22 }
   0x5   :  { %p1384_p0 = scmp.ne.s32.totalorder %s24_s22, %s1383_s23  ;;  %p1389_p2 = scmp.lt.s32.totalorder %s1383_s23, %s1383_s23 }
   0x7   :  { %p1390_p3 = por %p1389_p2, %p1388_p1 }
   0x9   :  { %p1391_p4 = pnand %p1390_p3, %p1384_p0 }
   0xb   :  { %1394 = shalt.err (!%p1391_p4)
}
   0xc   :  { %s1442_s24 = smov 128   ;;  %s1443_s25 = smov 8  }
   0xd   :  { %29 = dma.hbm_to_vmem [thread:$0]  %s1678_s2, 512, %s24_s22, [#allocation4], %s1442_s24, %s1442_s24, %s1443_s25  }
   0xe   :  { %s1444_s28 = smov [#allocation6]  }
   0xf   :  { %s37_s29 = sshll.u32 %s1444_s28, 4  ;;  %s38_s29 = int_to_ptr.vmem [resolvable:$true] %s37_s29 }
  0x10   :  { %s1403_s30 = scalar_lea.vmem %s38_s29, 512  ;;  %p1408_p6 = scmp.lt.s32.totalorder %s38_s29, %s38_s29 }
  0x11   :  { %p1404_p5 = scmp.ne.s32.totalorder %s38_s29, %s1403_s30  ;;  %p1409_p7 = scmp.lt.s32.totalorder %s1403_s30, %s1403_s30 }
  0x13   :  { %p1410_p8 = por %p1409_p7, %p1408_p6 }
  0x15   :  { %p1411_p9 = pnand %p1410_p8, %p1404_p5 }
  0x17   :  { %1414 = shalt.err (!%p1411_p9)
}
  0x18   :  { %43 = dma.hbm_to_vmem [thread:$0]  %s1680_s4, 512, %s38_s29, [#allocation7], %s1442_s24, %s1442_s24, %s1443_s25  }
  0x19   :  { %1435 = dma.done.wait [#allocation4], 512  }
  0x1a   :  { %1436 = vsyncadd [#allocation4], 4294966784 }
  0x1b   :  { %1437 = dma.done.wait [#allocation7], 512  }
  0x1c   :  { %1438 = vsyncadd [#allocation7], 4294966784  ;;  %v1445_v0 = vmov 0.0   ;;  %vm1446_vm0 = vmmov 0   ;;  %vm65_vm1 = vcmask 1043456   ;;  %vm61_vm2 = vcmask 31744  }
  0x1d   :  { %1203 = vmatprep.subr.mxu1 %v1445_v0  ;;  %1198 = vmatprep.subr.mxu0 %v1445_v0  ;;  %v1497_v1 = vld [vmem:[#allocation3 + $0x18] sm:$0xff]  ;;  %v1502_v3 = vld [vmem:[#allocation3 + $0x10] sm:$0xff]  ;;  %v1509_v5 = vld [vmem:[#allocation3 + $0x8] sm:$0xff]  ;;  %s1447_s11 = smov 64   ;;  %vm246_vm3 = vcmask 253952   ;;  %vm143_vm4 = vcmask 261120  }
  0x1e   :  { %1200 = vmatprep.mubr.msk.f32.mxu0 %vm1446_vm0, %v1445_v0  ;;  %1211 = vmatprep.mubr.msk.f32.mxu1 %vm1446_vm0, %v1445_v0  ;;  %v53_v2 = vld [vmem:[%s1677_s1] sm:$0xf]  ;;  %v1514_v6 = vld [vmem:[#allocation3] sm:$0xff]  ;;  %vm355_vm5 = vcmask 254977   ;;  %vm579_vm6 = vcmask 257027   ;;  %vm803_vm7 = vcmask 259077  }
  0x1f   :  { %1204 = vmatpush3.msra.mxu1 %v1497_v1  ;;  %1199 = vmatpush3.msk.msra.mxu0 %vm65_vm1, %v53_v2  ;;  %v52_v4 = vld [vmem:[%s1676_s0] sm:$0xff]  ;;  %vm467_vm8 = vcmask 256002   ;;  %vm691_vm9 = vcmask 258052   ;;  %vm915_vm10 = vcmask 260102   ;;  %vm1027_vm11 = vcmask 261127   ;;  %s1449_s14 = smov [#allocation8]  }
  0x20   :  { %1205 = vmatprep.subr.mxu1 %v1445_v0  ;;  %1201 = vmatmul.mubr.msk.f32.vlgmr.msra.gmra.mxu0 %vm61_vm2, %v52_v4  ;;  %v1131_v7 = vld [vmem:[%s1679_s3] ss:$0 sm:$0xff]  ;;  %s1448_s3 = smov 32   ;;  %s1121_s15 = sshll.u32 %s1449_s14, 4  ;;  %s1122_s15 = int_to_ptr.vmem [resolvable:$true] %s1121_s15 }
  0x21   :  { %1206 = vmatpush3.msra.mxu1 %v1502_v3  ;;  %1214 = vmatprep.subr.mxu0 %v1445_v0  ;;  %s1415_s16 = scalar_lea.vmem %s1122_s15, 128  ;;  %p1420_p11 = scmp.lt.s32.totalorder %s1122_s15, %s1122_s15 }
  0x22   :  { %1207 = vmatprep.subr.mxu1 %v1445_v0  ;;  %1215 = vmatpush3.msra.mxu0 %v1497_v1  ;;  %p1416_p10 = scmp.ne.s32.totalorder %s1122_s15, %s1415_s16  ;;  %p1421_p12 = scmp.lt.s32.totalorder %s1415_s16, %s1415_s16 }
  0x23   :  { %1208 = vmatpush3.msra.mxu1 %v1509_v5  ;;  %1216 = vmatprep.subr.mxu0 %v1445_v0 }
  0x24   :  { %1209 = vmatprep.subr.mxu1 %v1445_v0  ;;  %1217 = vmatpush3.msra.mxu0 %v1502_v3  ;;  %p1422_p13 = por %p1421_p12, %p1420_p11 }
  0x25   :  { %1210 = vmatpush3.msra.mxu1 %v1514_v6  ;;  %1218 = vmatprep.subr.mxu0 %v1445_v0 }
  0x26   :  { %1212 = vmatmul.mubr.f32.vlgmr.msra.gmra.mxu1 %v1445_v0  ;;  %1219 = vmatpush3.msra.mxu0 %v1509_v5  ;;  %p1423_p0 = pnand %p1422_p13, %p1416_p10 }
  0x27   :  { %1220 = vmatprep.subr.mxu0 %v1445_v0  ;;  %1222 = vmatprep.mubr.msk.f32.mxu0 %vm1446_vm0, %v1445_v0 }
  0x28   :  { %1221 = vmatpush3.msra.mxu0 %v1514_v6  ;;  %1225 = vmatprep.subr.mxu1 %v1445_v0 }
  0x29   :  { %1226 = vmatpush3.msra.mxu1 %v1497_v1  ;;  %1233 = vmatprep.mubr.msk.f32.mxu1 %vm1446_vm0, %v1445_v0 }
  0x2a   :  { %1227 = vmatprep.subr.mxu1 %v1445_v0  ;;  %1236 = vmatprep.subr.mxu0 %v1445_v0 }
  0x2b   :  { %1228 = vmatpush3.msra.mxu1 %v1502_v3 }
  0x2c   :  { %1229 = vmatprep.subr.mxu1 %v1445_v0 }
  0x2d   :  { %1230 = vmatpush3.msra.mxu1 %v1509_v5 }
  0x2e   :  { %1231 = vmatprep.subr.mxu1 %v1445_v0 }
  0x2f   :  { %1232 = vmatpush3.msra.mxu1 %v1514_v6 }
  0x30   :  { %1247 = vmatprep.subr.mxu1 %v1445_v0 }
  0xe0   :  { %v135_v8 = vpop.f32.mrf.mxu0 }
  0xe1   :  { %v1544_v10 = vadd.f32 %v1131_v7, %v135_v8 }
  0xe2   :  { %v1202_v9 = vpop.f32.mrf.mxu0 }
  0xe6   :  { %v213_v11 = vpop.f32.mrf.mxu1 }
  0xe7   :  { %v217_v12 = vadd.f32 %v213_v11, %v1544_v10 }
  0xe8   :  { %v1213_v13 = vpop.f32.mrf.mxu1 }
  0xe9   :  { %1311 = vtanh.f32 %v217_v12  ;;  %v1134_v15 = vmul.f32 -1.442695, %v217_v12 }
  0xeb   :  { %1313 = vpow2.f32 %v1134_v15 }
  0xf6   :  { %v1312_v14 = vpop.eup %1311 }
  0xf7   :  { %227 = vrot.lane.b32.xlu0 %v1312_v14, %s1447_s11 }
  0xf8   :  { %v1314_v16 = vpop.eup %1313 }
  0xf9   :  { %v221_v17 = vadd.f32 1.0, %v1314_v16 }
  0xfb   :  { %1315 = vrcp.f32 %v221_v17 }
 0x108   :  { %v1316_v18 = vpop.eup %1315 }
 0x109   :  { %v225_v21 = vmul.f32 0.0, %v1316_v18 }
 0x169   :  { %v228_v19 = vpop.permute.xlu0 %227 }
 0x16a   :  { %v230_v20 = vmul.f32 %v1316_v18, %v228_v19 }
 0x16c   :  { %232 = vrot.lane.b32.xlu0 %v230_v20, %s1448_s3 }
 0x1de   :  { %v233_v22 = vpop.permute.xlu0 %232 }
 0x1df   :  { %v235_v23 = vadd.f32 %v233_v22, %v225_v21 }
 0x1e1   :  { %1317 = vtanh.f32 %v235_v23  ;;  %v332_v39 = vrot.slane %v235_v23, 7 }
 0x1ee   :  { %v1318_v24 = vpop.eup %1317 }
 0x1ef   :  { %238 = vrot.lane.b32.xlu1 %v1318_v24, %s1447_s11 }
 0x261   :  { %v239_v25 = vpop.permute.xlu1 %238 }
 0x262   :  { %v241_v26 = vmul.f32 %v1316_v18, %v239_v25 }
 0x264   :  { %243 = vrot.lane.b32.xlu1 %v241_v26, %s1448_s3 }
 0x2d6   :  { %v244_v27 = vpop.permute.xlu1 %243 }
 0x2d7   :  { %247 = vst.msk [vmem:[#allocation2] sm:$0x1] %vm246_vm3, %v244_v27  ;;  %1223 = vmatmul.mubr.msk.f32.vlgmr.msra.gmra.mxu0 %vm143_vm4, %v244_v27 }
 0x2d8   :  { %1237 = vmatpush3.msra.mxu0 %v1497_v1  ;;  %1244 = vmatprep.mubr.msk.f32.mxu0 %vm1446_vm0, %v1445_v0 }
 0x2d9   :  { %1238 = vmatprep.subr.mxu0 %v1445_v0 }
 0x2da   :  { %1239 = vmatpush3.msra.mxu0 %v1502_v3 }
 0x2db   :  { %1240 = vmatprep.subr.mxu0 %v1445_v0 }
 0x2dc   :  { %1241 = vmatpush3.msra.mxu0 %v1509_v5 }
 0x2dd   :  { %1242 = vmatprep.subr.mxu0 %v1445_v0 }
 0x2de   :  { %1243 = vmatpush3.msra.mxu0 %v1514_v6 }
 0x2df   :  { %1258 = vmatprep.subr.mxu0 %v1445_v0 }
 0x397   :  { %v316_v28 = vpop.f32.mrf.mxu0 }
 0x398   :  { %v321_v29 = vrot.slane %v316_v28, 7 }
 0x399   :  { %v1224_v30 = vpop.f32.mrf.mxu0 }
 0x39a   :  { %v323_v31 = vadd.f32 %v321_v29, %v1544_v10 }
 0x39c   :  { %1319 = vtanh.f32 %v323_v31  ;;  %v1136_v33 = vmul.f32 -1.442695, %v323_v31 }
 0x39e   :  { %1321 = vpow2.f32 %v1136_v33 }
 0x3a9   :  { %v1320_v32 = vpop.eup %1319 }
 0x3aa   :  { %336 = vrot.lane.b32.xlu0 %v1320_v32, %s1447_s11 }
 0x3ab   :  { %v1322_v34 = vpop.eup %1321 }
 0x3ac   :  { %v327_v35 = vadd.f32 1.0, %v1322_v34 }
 0x3ae   :  { %1323 = vrcp.f32 %v327_v35 }
 0x3bb   :  { %v1324_v36 = vpop.eup %1323 }
 0x3bc   :  { %v334_v40 = vmul.f32 %v1324_v36, %v332_v39 }
 0x41c   :  { %v337_v37 = vpop.permute.xlu0 %336 }
 0x41d   :  { %v339_v38 = vmul.f32 %v1324_v36, %v337_v37 }
 0x41f   :  { %341 = vrot.lane.b32.xlu1 %v339_v38, %s1448_s3 }
 0x491   :  { %v342_v41 = vpop.permute.xlu1 %341 }
 0x492   :  { %v344_v42 = vadd.f32 %v342_v41, %v334_v40 }
 0x494   :  { %1325 = vtanh.f32 %v344_v42  ;;  %v444_v59 = vrot.slane %v344_v42, 7 }
 0x4a1   :  { %v1326_v43 = vpop.eup %1325 }
 0x4a2   :  { %347 = vrot.lane.b32.xlu0 %v1326_v43, %s1447_s11 }
 0x514   :  { %v348_v44 = vpop.permute.xlu0 %347 }
 0x515   :  { %v1566_v45 = vmul.f32 %v1324_v36, %v348_v44 }
 0x517   :  { %v357_v46 = vrot.slane %v1566_v45, 1 }
 0x519   :  { %358 = vrot.lane.b32.xlu1 %v357_v46, %s1448_s3 }
 0x58b   :  { %v359_v47 = vpop.permute.xlu1 %358 }
 0x58c   :  { %1234 = vmatmul.mubr.msk.f32.vlgmr.msra.gmra.mxu1 %vm143_vm4, %v359_v47 }
 0x58d   :  { %1248 = vmatpush3.msra.mxu1 %v1497_v1  ;;  %1255 = vmatprep.mubr.msk.f32.mxu1 %vm1446_vm0, %v1445_v0 }
 0x58e   :  { %1249 = vmatprep.subr.mxu1 %v1445_v0 }
 0x58f   :  { %1250 = vmatpush3.msra.mxu1 %v1502_v3 }
 0x590   :  { %1251 = vmatprep.subr.mxu1 %v1445_v0 }
 0x591   :  { %1252 = vmatpush3.msra.mxu1 %v1509_v5 }
 0x592   :  { %1253 = vmatprep.subr.mxu1 %v1445_v0 }
 0x593   :  { %1254 = vmatpush3.msra.mxu1 %v1514_v6 }
 0x594   :  { %1269 = vmatprep.subr.mxu1 %v1445_v0 }
 0x64c   :  { %v428_v48 = vpop.f32.mrf.mxu1 }
 0x64d   :  { %v433_v49 = vrot.slane %v428_v48, 6 }
 0x64e   :  { %v1235_v50 = vpop.f32.mrf.mxu1 }
 0x64f   :  { %v435_v51 = vadd.f32 %v433_v49, %v1544_v10 }
 0x651   :  { %1327 = vtanh.f32 %v435_v51  ;;  %v1138_v53 = vmul.f32 -1.442695, %v435_v51 }
 0x653   :  { %1329 = vpow2.f32 %v1138_v53 }
 0x65e   :  { %v1328_v52 = vpop.eup %1327 }
 0x65f   :  { %448 = vrot.lane.b32.xlu0 %v1328_v52, %s1447_s11 }
 0x660   :  { %v1330_v54 = vpop.eup %1329 }
 0x661   :  { %v439_v55 = vadd.f32 1.0, %v1330_v54 }
 0x663   :  { %1331 = vrcp.f32 %v439_v55 }
 0x670   :  { %v1332_v56 = vpop.eup %1331 }
 0x671   :  { %v446_v60 = vmul.f32 %v1332_v56, %v444_v59 }
 0x6d1   :  { %v449_v57 = vpop.permute.xlu0 %448 }
 0x6d2   :  { %v451_v58 = vmul.f32 %v1332_v56, %v449_v57 }
 0x6d4   :  { %453 = vrot.lane.b32.xlu1 %v451_v58, %s1448_s3 }
 0x746   :  { %v454_v61 = vpop.permute.xlu1 %453 }
 0x747   :  { %v456_v62 = vadd.f32 %v454_v61, %v446_v60 }
 0x749   :  { %1333 = vtanh.f32 %v456_v62  ;;  %v556_v21 = vrot.slane %v456_v62, 7 }
 0x756   :  { %v1334_v63 = vpop.eup %1333 }
 0x757   :  { %459 = vrot.lane.b32.xlu0 %v1334_v63, %s1447_s11 }
 0x7c9   :  { %v460_v2 = vpop.permute.xlu0 %459 }
 0x7ca   :  { %v1585_v4 = vmul.f32 %v1332_v56, %v460_v2 }
 0x7cc   :  { %v469_v7 = vrot.slane %v1585_v4, 2 }
 0x7ce   :  { %470 = vrot.lane.b32.xlu1 %v469_v7, %s1448_s3 }
 0x840   :  { %v471_v8 = vpop.permute.xlu1 %470 }
 0x841   :  { %1245 = vmatmul.mubr.msk.f32.vlgmr.msra.gmra.mxu0 %vm143_vm4, %v471_v8 }
 0x842   :  { %1259 = vmatpush3.msra.mxu0 %v1497_v1  ;;  %1266 = vmatprep.mubr.msk.f32.mxu0 %vm1446_vm0, %v1445_v0 }
 0x843   :  { %1260 = vmatprep.subr.mxu0 %v1445_v0 }
 0x844   :  { %1261 = vmatpush3.msra.mxu0 %v1502_v3 }
 0x845   :  { %1262 = vmatprep.subr.mxu0 %v1445_v0 }
 0x846   :  { %1263 = vmatpush3.msra.mxu0 %v1509_v5 }
 0x847   :  { %1264 = vmatprep.subr.mxu0 %v1445_v0 }
 0x848   :  { %1265 = vmatpush3.msra.mxu0 %v1514_v6 }
 0x849   :  { %1280 = vmatprep.subr.mxu0 %v1445_v0 }
 0x901   :  { %v540_v9 = vpop.f32.mrf.mxu0 }
 0x902   :  { %v545_v11 = vrot.slane %v540_v9, 5 }
 0x903   :  { %v1246_v12 = vpop.f32.mrf.mxu0 }
 0x904   :  { %v547_v13 = vadd.f32 %v545_v11, %v1544_v10 }
 0x906   :  { %1335 = vtanh.f32 %v547_v13  ;;  %v1140_v15 = vmul.f32 -1.442695, %v547_v13 }
 0x908   :  { %1337 = vpow2.f32 %v1140_v15 }
 0x913   :  { %v1336_v14 = vpop.eup %1335 }
 0x914   :  { %560 = vrot.lane.b32.xlu0 %v1336_v14, %s1447_s11 }
 0x915   :  { %v1338_v16 = vpop.eup %1337 }
 0x916   :  { %v551_v17 = vadd.f32 1.0, %v1338_v16 }
 0x918   :  { %1339 = vrcp.f32 %v551_v17 }
 0x925   :  { %v1340_v18 = vpop.eup %1339 }
 0x926   :  { %v558_v22 = vmul.f32 %v1340_v18, %v556_v21 }
 0x986   :  { %v561_v19 = vpop.permute.xlu0 %560 }
 0x987   :  { %v563_v20 = vmul.f32 %v1340_v18, %v561_v19 }
 0x989   :  { %565 = vrot.lane.b32.xlu1 %v563_v20, %s1448_s3 }
 0x9fb   :  { %v566_v23 = vpop.permute.xlu1 %565 }
 0x9fc   :  { %v568_v24 = vadd.f32 %v566_v23, %v558_v22 }
 0x9fe   :  { %1341 = vtanh.f32 %v568_v24  ;;  %v668_v41 = vrot.slane %v568_v24, 7 }
 0xa0b   :  { %v1342_v25 = vpop.eup %1341 }
 0xa0c   :  { %571 = vrot.lane.b32.xlu0 %v1342_v25, %s1447_s11 }
 0xa7e   :  { %v572_v26 = vpop.permute.xlu0 %571 }
 0xa7f   :  { %v1604_v27 = vmul.f32 %v1340_v18, %v572_v26 }
 0xa81   :  { %v581_v28 = vrot.slane %v1604_v27, 3 }
 0xa83   :  { %582 = vrot.lane.b32.xlu1 %v581_v28, %s1448_s3 }
 0xaf5   :  { %v583_v29 = vpop.permute.xlu1 %582 }
 0xaf6   :  { %1256 = vmatmul.mubr.msk.f32.vlgmr.msra.gmra.mxu1 %vm143_vm4, %v583_v29 }
 0xaf7   :  { %1270 = vmatpush3.msra.mxu1 %v1497_v1  ;;  %1277 = vmatprep.mubr.msk.f32.mxu1 %vm1446_vm0, %v1445_v0 }
 0xaf8   :  { %1271 = vmatprep.subr.mxu1 %v1445_v0 }
 0xaf9   :  { %1272 = vmatpush3.msra.mxu1 %v1502_v3 }
 0xafa   :  { %1273 = vmatprep.subr.mxu1 %v1445_v0 }
 0xafb   :  { %1274 = vmatpush3.msra.mxu1 %v1509_v5 }
 0xafc   :  { %1275 = vmatprep.subr.mxu1 %v1445_v0 }
 0xafd   :  { %1276 = vmatpush3.msra.mxu1 %v1514_v6 }
 0xafe   :  { %1291 = vmatprep.subr.mxu1 %v1445_v0 }
 0xbb6   :  { %v652_v30 = vpop.f32.mrf.mxu1 }
 0xbb7   :  { %v657_v31 = vrot.slane %v652_v30, 4 }
 0xbb8   :  { %v1257_v32 = vpop.f32.mrf.mxu1 }
 0xbb9   :  { %v659_v33 = vadd.f32 %v657_v31, %v1544_v10 }
 0xbbb   :  { %1343 = vtanh.f32 %v659_v33  ;;  %v1142_v35 = vmul.f32 -1.442695, %v659_v33 }
 0xbbd   :  { %1345 = vpow2.f32 %v1142_v35 }
 0xbc8   :  { %v1344_v34 = vpop.eup %1343 }
 0xbc9   :  { %672 = vrot.lane.b32.xlu0 %v1344_v34, %s1447_s11 }
 0xbca   :  { %v1346_v36 = vpop.eup %1345 }
 0xbcb   :  { %v663_v37 = vadd.f32 1.0, %v1346_v36 }
 0xbcd   :  { %1347 = vrcp.f32 %v663_v37 }
 0xbda   :  { %v1348_v38 = vpop.eup %1347 }
 0xbdb   :  { %v670_v42 = vmul.f32 %v1348_v38, %v668_v41 }
 0xc3b   :  { %v673_v39 = vpop.permute.xlu0 %672 }
 0xc3c   :  { %v675_v40 = vmul.f32 %v1348_v38, %v673_v39 }
 0xc3e   :  { %677 = vrot.lane.b32.xlu1 %v675_v40, %s1448_s3 }
 0xcb0   :  { %v678_v43 = vpop.permute.xlu1 %677 }
 0xcb1   :  { %v680_v44 = vadd.f32 %v678_v43, %v670_v42 }
 0xcb3   :  { %1349 = vtanh.f32 %v680_v44 }
 0xcc0   :  { %v1350_v46 = vpop.eup %1349 }
 0xcc1   :  { %683 = vrot.lane.b32.xlu0 %v1350_v46, %s1447_s11 }
 0xd33   :  { %v684_v47 = vpop.permute.xlu0 %683 }
 0xd34   :  { %v1623_v48 = vmul.f32 %v1348_v38, %v684_v47 }
 0xd36   :  { %v693_v49 = vrot.slane %v1623_v48, 4 }
 0xd38   :  { %694 = vrot.lane.b32.xlu1 %v693_v49, %s1448_s3 }
 0xdaa   :  { %v695_v50 = vpop.permute.xlu1 %694 }
 0xdab   :  { %1267 = vmatmul.mubr.msk.f32.vlgmr.msra.gmra.mxu0 %vm143_vm4, %v695_v50  ;;  %v1032_v50 = vld [vmem:[#allocation6 + $0x10] sm:$0xff] }
 0xdac   :  { %1281 = vmatpush3.msra.mxu0 %v1497_v1  ;;  %1288 = vmatprep.mubr.msk.f32.mxu0 %vm1446_vm0, %v1445_v0 }
 0xdad   :  { %1282 = vmatprep.subr.mxu0 %v1445_v0 }
 0xdae   :  { %1283 = vmatpush3.msra.mxu0 %v1502_v3 }
 0xdaf   :  { %1284 = vmatprep.subr.mxu0 %v1445_v0 }
 0xdb0   :  { %1285 = vmatpush3.msra.mxu0 %v1509_v5 }
 0xdb1   :  { %1286 = vmatprep.subr.mxu0 %v1445_v0 }
 0xdb2   :  { %1287 = vmatpush3.msra.mxu0 %v1514_v6  ;;  %v780_v6 = vrot.slane %v680_v44, 7 }
 0xe6b   :  { %v764_v51 = vpop.f32.mrf.mxu0 }
 0xe6c   :  { %v769_v52 = vrot.slane %v764_v51, 3  ;;  %v1031_v51 = vld [vmem:[#allocation6 + $0x8] sm:$0xff] }
 0xe6d   :  { %v1268_v53 = vpop.f32.mrf.mxu0 }
 0xe6e   :  { %v771_v1 = vadd.f32 %v769_v52, %v1544_v10  ;;  %v1030_v52 = vld [vmem:[#allocation6] sm:$0xff] }
 0xe70   :  { %1351 = vtanh.f32 %v771_v1  ;;  %v1144_v55 = vmul.f32 -1.442695, %v771_v1 }
 0xe72   :  { %1353 = vpow2.f32 %v1144_v55 }
 0xe7d   :  { %v1352_v54 = vpop.eup %1351 }
 0xe7e   :  { %784 = vrot.lane.b32.xlu0 %v1352_v54, %s1447_s11 }
 0xe7f   :  { %v1354_v3 = vpop.eup %1353 }
 0xe80   :  { %v775_v56 = vadd.f32 1.0, %v1354_v3 }
 0xe82   :  { %1355 = vrcp.f32 %v775_v56 }
 0xe8f   :  { %v1356_v57 = vpop.eup %1355 }
 0xe90   :  { %v782_v59 = vmul.f32 %v1356_v57, %v780_v6 }
 0xef0   :  { %v785_v5 = vpop.permute.xlu0 %784 }
 0xef1   :  { %v787_v58 = vmul.f32 %v1356_v57, %v785_v5 }
 0xef3   :  { %789 = vrot.lane.b32.xlu1 %v787_v58, %s1448_s3 }
 0xf65   :  { %v790_v60 = vpop.permute.xlu1 %789 }
 0xf66   :  { %v792_v61 = vadd.f32 %v790_v60, %v782_v59 }
 0xf68   :  { %1357 = vtanh.f32 %v792_v61  ;;  %v892_v21 = vrot.slane %v792_v61, 7 }
 0xf75   :  { %v1358_v62 = vpop.eup %1357 }
 0xf76   :  { %795 = vrot.lane.b32.xlu0 %v1358_v62, %s1447_s11 }
 0xfe8   :  { %v796_v63 = vpop.permute.xlu0 %795 }
 0xfe9   :  { %v798_v2 = vmul.f32 %v1356_v57, %v796_v63 }
 0xfeb   :  { %v805_v7 = vrot.slane %v798_v2, 5 }
 0xfed   :  { %806 = vrot.lane.b32.xlu1 %v805_v7, %s1448_s3 }
0x105f   :  { %v807_v8 = vpop.permute.xlu1 %806 }
0x1060   :  { %1278 = vmatmul.mubr.msk.f32.vlgmr.msra.gmra.mxu1 %vm143_vm4, %v807_v8 }
0x1061   :  { %1299 = vmatprep.mubr.msk.f32.mxu1 %vm1446_vm0, %v1445_v0 }
0x1120   :  { %v876_v9 = vpop.f32.mrf.mxu1 }
0x1121   :  { %v881_v11 = vrot.slane %v876_v9, 2 }
0x1122   :  { %v1279_v12 = vpop.f32.mrf.mxu1 }
0x1123   :  { %v883_v13 = vadd.f32 %v881_v11, %v1544_v10 }
0x1125   :  { %1359 = vtanh.f32 %v883_v13  ;;  %v1146_v15 = vmul.f32 -1.442695, %v883_v13 }
0x1127   :  { %1361 = vpow2.f32 %v1146_v15 }
0x1132   :  { %v1360_v14 = vpop.eup %1359 }
0x1133   :  { %896 = vrot.lane.b32.xlu0 %v1360_v14, %s1447_s11 }
0x1134   :  { %v1362_v16 = vpop.eup %1361 }
0x1135   :  { %v887_v17 = vadd.f32 1.0, %v1362_v16 }
0x1137   :  { %1363 = vrcp.f32 %v887_v17 }
0x1144   :  { %v1364_v18 = vpop.eup %1363 }
0x1145   :  { %v894_v22 = vmul.f32 %v1364_v18, %v892_v21 }
0x11a5   :  { %v897_v19 = vpop.permute.xlu0 %896 }
0x11a6   :  { %v899_v20 = vmul.f32 %v1364_v18, %v897_v19 }
0x11a8   :  { %901 = vrot.lane.b32.xlu1 %v899_v20, %s1448_s3 }
0x121a   :  { %v902_v23 = vpop.permute.xlu1 %901 }
0x121b   :  { %v904_v24 = vadd.f32 %v902_v23, %v894_v22 }
0x121d   :  { %1365 = vtanh.f32 %v904_v24 }
0x122a   :  { %v1366_v25 = vpop.eup %1365 }
0x122b   :  { %907 = vrot.lane.b32.xlu0 %v1366_v25, %s1447_s11 }
0x129d   :  { %v908_v26 = vpop.permute.xlu0 %907 }
0x129e   :  { %v910_v28 = vmul.f32 %v1364_v18, %v908_v26 }
0x12a0   :  { %v917_v29 = vrot.slane %v910_v28, 6 }
0x12a2   :  { %918 = vrot.lane.b32.xlu1 %v917_v29, %s1448_s3 }
0x1314   :  { %v919_v30 = vpop.permute.xlu1 %918 }
0x1315   :  { %1289 = vmatmul.mubr.msk.f32.vlgmr.msra.gmra.mxu0 %vm143_vm4, %v919_v30 }
0x13d5   :  { %v988_v31 = vpop.f32.mrf.mxu0 }
0x13d6   :  { %v993_v32 = vrot.slane %v988_v31, 1 }
0x13d7   :  { %v1290_v33 = vpop.f32.mrf.mxu0 }
0x13d8   :  { %v995_v34 = vadd.f32 %v993_v32, %v1544_v10  ;;  %v1004_v10 = vrot.slane %v904_v24, 7 }
0x13da   :  { %1367 = vtanh.f32 %v995_v34  ;;  %v1148_v36 = vmul.f32 -1.442695, %v995_v34 }
0x13dc   :  { %1369 = vpow2.f32 %v1148_v36 }
0x13e7   :  { %v1368_v35 = vpop.eup %1367 }
0x13e8   :  { %1008 = vrot.lane.b32.xlu0 %v1368_v35, %s1447_s11 }
0x13e9   :  { %v1370_v37 = vpop.eup %1369 }
0x13ea   :  { %v999_v38 = vadd.f32 1.0, %v1370_v37 }
0x13ec   :  { %1371 = vrcp.f32 %v999_v38 }
0x13f9   :  { %v1372_v39 = vpop.eup %1371 }
0x13fa   :  { %v1006_v42 = vmul.f32 %v1372_v39, %v1004_v10 }
0x145a   :  { %v1009_v40 = vpop.permute.xlu0 %1008 }
0x145b   :  { %v1011_v41 = vmul.f32 %v1372_v39, %v1009_v40 }
0x145d   :  { %1013 = vrot.lane.b32.xlu1 %v1011_v41, %s1448_s3 }
0x1461   :  { %352 = vrot.lane.b32.xlu1 %v1566_v45, %s1448_s3 }
0x1465   :  { %576 = vrot.lane.b32.xlu1 %v1604_v27, %s1448_s3  ;;  %v1033_v27 = vld [vmem:[#allocation6 + $0x18] sm:$0xff] }
0x1466   :  { %1292 = vmatpush3.msra.mxu1 %v1033_v27 }
0x1467   :  { %1293 = vmatprep.subr.mxu1 %v1445_v0 }
0x1468   :  { %1294 = vmatpush3.msra.mxu1 %v1032_v50 }
0x1469   :  { %800 = vrot.lane.b32.xlu1 %v798_v2, %s1448_s3  ;;  %1295 = vmatprep.subr.mxu1 %v1445_v0 }
0x146a   :  { %1296 = vmatpush3.msra.mxu1 %v1031_v51 }
0x146b   :  { %1297 = vmatprep.subr.mxu1 %v1445_v0  ;;  %v1149_v0 = vld [vmem:[%s1681_s5] ss:$0 sm:$0xff] }
0x146c   :  { %1298 = vmatpush3.msra.mxu1 %v1030_v52 }
0x14cf   :  { %v1014_v43 = vpop.permute.xlu1 %1013 }
0x14d0   :  { %v1016_v44 = vadd.f32 %v1014_v43, %v1006_v42 }
0x14d2   :  { %1373 = vtanh.f32 %v1016_v44 }
0x14d3   :  { %v353_v46 = vpop.permute.xlu1 %352 }
0x14d4   :  { %356 = vst.msk [vmem:[#allocation2] sm:$0x2] %vm355_vm5, %v353_v46 }
0x14d7   :  { %v577_v47 = vpop.permute.xlu1 %576 }
0x14d8   :  { %580 = vst.msk [vmem:[#allocation2] sm:$0x8] %vm579_vm6, %v577_v47 }
0x14db   :  { %v801_v49 = vpop.permute.xlu1 %800 }
0x14dc   :  { %804 = vst.msk [vmem:[#allocation2] sm:$0x20] %vm803_vm7, %v801_v49 }
0x14df   :  { %v1374_v45 = vpop.eup %1373 }
0x14e0   :  { %1019 = vrot.lane.b32.xlu0 %v1374_v45, %s1447_s11 }
0x14e4   :  { %464 = vrot.lane.b32.xlu0 %v1585_v4, %s1448_s3 }
0x14e8   :  { %688 = vrot.lane.b32.xlu0 %v1623_v48, %s1448_s3 }
0x14ec   :  { %912 = vrot.lane.b32.xlu0 %v910_v28, %s1448_s3 }
0x1552   :  { %v1020_v4 = vpop.permute.xlu0 %1019 }
0x1553   :  { %v1022_v53 = vmul.f32 %v1372_v39, %v1020_v4 }
0x1555   :  { %1024 = vrot.lane.b32.xlu1 %v1022_v53, %s1448_s3 }
0x1556   :  { %v465_v48 = vpop.permute.xlu0 %464 }
0x1557   :  { %468 = vst.msk [vmem:[#allocation2] sm:$0x4] %vm467_vm8, %v465_v48 }
0x155a   :  { %v689_v1 = vpop.permute.xlu0 %688 }
0x155b   :  { %692 = vst.msk [vmem:[#allocation2] sm:$0x10] %vm691_vm9, %v689_v1 }
0x155e   :  { %v913_v54 = vpop.permute.xlu0 %912 }
0x155f   :  { %916 = vst.msk [vmem:[#allocation2] sm:$0x40] %vm915_vm10, %v913_v54 }
0x15c7   :  { %v1025_v55 = vpop.permute.xlu1 %1024 }
0x15c8   :  { %1028 = vst.msk [vmem:[#allocation2] sm:$0x80] %vm1027_vm11, %v1025_v55 }
0x15cf   :  { %v1029_v3 = vld [vmem:[#allocation2] sm:$0xff] }
0x15d0   :  { %1300 = vmatmul.mubr.msk.f32.vlgmr.msra.gmra.mxu1 %vm143_vm4, %v1029_v3 }
0x1690   :  { %v1110_v56 = vpop.f32.mrf.mxu1 }
0x1691   :  { %v1111_v57 = vadd.f32 %v1149_v0, %v1110_v56 }
0x1692   :  { %v1301_v5 = vpop.f32.mrf.mxu1 }
0x1693   :  { %1114 = vst [vmem:[#allocation8] sm:$0xff] %v1111_v57 }
0x1694   :  { %1426 = shalt.err (!%p1423_p0)
}
0x1695   :  { %1124 = dma.vmem_to_hbm [thread:$0]  %s1122_s15, 128, %s1682_s6, [#allocation5]  }
0x1696   :  { %1439 = dma.done.wait [#allocation5], 128  }
0x1697   :  { %1440 = vsyncadd [#allocation5], 4294967168 }
0x1698   :  { %1128 = vsyncpa [#allocation4], 1 }
0x1699   :  { %1129 = vsyncpa [#allocation7], 1 }
0x169a   :  { %1130 = vsyncpa [#allocation5], 1 }

</bundles_post_ra>
